<compile_context>
chip_gen: v7x
topology: tpu7x:2x2x1
jax: 0.10.0
libtpu: 0.0.40
codegen_flags: <defaults>
</compile_context>

<pallas_src>
import functools

import jax
import jax.numpy as jnp
from jax.experimental import pallas as pl
from jax.experimental.pallas import tpu as pltpu


def hlq_branch_kernel(x_ref, w1_ref, b1_ref, w2_ref, b2_ref, pred_ref, feat_ref):
    x = x_ref[...]                                               # [tb, 64] f32
    # fc_1: Linear(64, 16) + LeakyReLU(0.01)
    h = jnp.dot(x, w1_ref[...], preferred_element_type=jnp.float32) + b1_ref[...]
    h = jnp.where(h >= 0.0, h, 0.01 * h)
    # feature = h / (L2-norm over dim=1 + 1e-9)
    denom = jnp.sqrt(jnp.sum(h * h, axis=1, keepdims=True)) + 1e-9   # [tb, 1]
    inv = pl.reciprocal(denom, approx=True)                     # EUP slot
    inv = inv * (2.0 - denom * inv)                              # 1 Newton step -> ~f32 exact
    feat = h * inv                                               # [tb, 16]
    # fc_pred: Linear(16, C)
    pred = jnp.dot(feat, w2_ref[...], preferred_element_type=jnp.float32) + b2_ref[...]
    # One full-ref store per output (no partial sub-slice stores).
    pred_ref[...] = pred
    feat_ref[...] = feat


@functools.partial(jax.jit, static_argnames=("tile_b",))
def hlq_branch(x, w1, b1, w2, b2, *, tile_b=8192):
    """x: [B, 64] f32 -> (pred [B, C], feature [B, 16])."""
    B, Din = x.shape
    C = w2.shape[1]

    # Batch tile: multiple of 8, large enough to amortize per-step overhead,
    # but capped so there are >= ~4 grid steps (v7x megacore gets both TCs
    # busy; also keeps double-buffered blocks well under v5e's 16 MiB scoped
    # VMEM default: tb=8192 -> x tile 2 MiB, outputs < 1 MiB).
    tb = min(tile_b, ((pl.cdiv(B, 4) + 7) // 8) * 8)
    tb = max(8, (tb // 8) * 8)
    grid = (pl.cdiv(B, tb),)                                     # ragged last block OK

    cost = pl.CostEstimate(
        flops=int(2 * B * (Din * 16 + 16 * C)),
        transcendentals=int(2 * B),                              # sqrt + reciprocal per row
        bytes_accessed=int(4 * (B * (Din + 16 + C) + Din * 16 + 16 + 16 * C + C)),
    )

    pred, feat = pl.pallas_call(
        hlq_branch_kernel,
        out_shape=(
            jax.ShapeDtypeStruct((B, C), jnp.float32),           # pred
            jax.ShapeDtypeStruct((B, 16), jnp.float32),          # feature
        ),
        grid=grid,
        in_specs=[
            pl.BlockSpec((tb, Din), lambda i: (i, 0)),           # x: streamed per tile
            pl.BlockSpec((Din, 16), lambda i: (0, 0)),           # W1: resident
            pl.BlockSpec((1, 16), lambda i: (0, 0)),             # b1: resident
            pl.BlockSpec((16, C), lambda i: (0, 0)),             # W2: resident
            pl.BlockSpec((1, C), lambda i: (0, 0)),              # b2: resident
        ],
        out_specs=(
            pl.BlockSpec((tb, C), lambda i: (i, 0)),
            pl.BlockSpec((tb, 16), lambda i: (i, 0)),
        ),
        compiler_params=pltpu.CompilerParams(
            dimension_semantics=("parallel",),
        ),
        cost_estimate=cost,
    )(x, w1, b1, w2, b2)

    return pred, feat


def init_params(key, num_classes):
    """Deterministic init matching nn.Linear's U(-1/sqrt(fan_in), 1/sqrt(fan_in))."""
    k1, k2, k3, k4 = jax.random.split(key, 4)
    lim1 = 1.0 / jnp.sqrt(64.0)
    lim2 = 1.0 / jnp.sqrt(16.0)
    w1 = jax.random.uniform(k1, (64, 16), jnp.float32, -lim1, lim1)   # [in, out]
    b1 = jax.random.uniform(k2, (1, 16), jnp.float32, -lim1, lim1)
    w2 = jax.random.uniform(k3, (16, num_classes), jnp.float32, -lim2, lim2)
    b2 = jax.random.uniform(k4, (1, num_classes), jnp.float32, -lim2, lim2)
    return w1, b1, w2, b2


if __name__ == "__main__":
    num_classes = 10
    B = 50          # deliberately NOT a multiple of the batch tile -> exercises ragged grid
    key = jax.random.PRNGKey(0)
    kx, kp = jax.random.split(key)
    x = jax.random.normal(kx, (B, 64), jnp.float32)
    w1, b1, w2, b2 = init_params(kp, num_classes)

    pred, feat = hlq_branch(x, w1, b1, w2, b2)
    jax.block_until_ready((pred, feat))

    # Pure-JAX reference for sanity check.
    h_ref = x @ w1 + b1
    h_ref = jnp.where(h_ref >= 0, h_ref, 0.01 * h_ref)
    feat_ref = h_ref / (jnp.linalg.norm(h_ref, axis=1, keepdims=True) + 1e-9)
    pred_ref = feat_ref @ w2 + b2
    assert pred.shape == (B, num_classes) and feat.shape == (B, 16)
    assert jnp.allclose(pred, pred_ref, atol=1e-5), "pred mismatch"
    assert jnp.allclose(feat, feat_ref, atol=1e-5), "feature mismatch"

    print("KERNEL_OK")
</pallas_src>

<mosaic_0001>
module attributes {stable_mosaic.version = 11 : i64} {
  func.func @hlq_branch_kernel(%arg0: i32, %arg1: memref<16x64xf32, #tpu.memory_space<vmem>>, %arg2: memref<64x16xf32, #tpu.memory_space<vmem>>, %arg3: memref<1x16xf32, #tpu.memory_space<vmem>>, %arg4: memref<16x10xf32, #tpu.memory_space<vmem>>, %arg5: memref<1x10xf32, #tpu.memory_space<vmem>>, %arg6: memref<16x10xf32, #tpu.memory_space<vmem>>, %arg7: memref<16x16xf32, #tpu.memory_space<vmem>>) attributes {dimension_semantics = [#tpu.dimension_semantics<parallel>], iteration_bounds = array<i64: 4>, scalar_prefetch = 0 : i64, scratch_operands = 0 : i64, tpu.core_type = #tpu.core_type<tc>, window_params = [{transform_indices = @transform_0, window_bounds = array<i64: 16, 64>}, {pipeline_mode = #tpu.pipeline_mode<synchronous>, transform_indices = @transform_1, window_bounds = array<i64: 64, 16>}, {pipeline_mode = #tpu.pipeline_mode<synchronous>, transform_indices = @transform_2, window_bounds = array<i64: 1, 16>}, {pipeline_mode = #tpu.pipeline_mode<synchronous>, transform_indices = @transform_3, window_bounds = array<i64: 16, 10>}, {pipeline_mode = #tpu.pipeline_mode<synchronous>, transform_indices = @transform_4, window_bounds = array<i64: 1, 10>}, {transform_indices = @transform_5, window_bounds = array<i64: 16, 10>}, {transform_indices = @transform_6, window_bounds = array<i64: 16, 16>}]} {
    %c0 = arith.constant 0 : index
    %c0_0 = arith.constant 0 : index
    %0 = vector.load %arg1[%c0, %c0_0] : memref<16x64xf32, #tpu.memory_space<vmem>>, vector<16x64xf32>
    %c0_1 = arith.constant 0 : index
    %c0_2 = arith.constant 0 : index
    %1 = vector.load %arg2[%c0_1, %c0_2] : memref<64x16xf32, #tpu.memory_space<vmem>>, vector<64x16xf32>
    %cst = arith.constant dense<0.000000e+00> : vector<16x16xf32>
    %2 = tpu.matmul %0, %1, %cst {dimension_numbers = #tpu.dot_dimension_numbers<[1], [0], [0], [1], [0, 0, 1, 1], [], []>} : vector<16x64xf32>, vector<64x16xf32>, vector<16x16xf32> -> vector<16x16xf32>
    %c0_3 = arith.constant 0 : index
    %c0_4 = arith.constant 0 : index
    %3 = vector.load %arg3[%c0_3, %c0_4] : memref<1x16xf32, #tpu.memory_space<vmem>>, vector<1x16xf32>
    %4 = vector.broadcast %3 : vector<1x16xf32> to vector<16x16xf32>
    %5 = arith.addf %2, %4 : vector<16x16xf32>
    %cst_5 = arith.constant 0.000000e+00 : f32
    %6 = vector.broadcast %cst_5 : f32 to vector<16x16xf32>
    %7 = arith.cmpf oge, %5, %6 : vector<16x16xf32>
    %cst_6 = arith.constant 0.00999999977 : f32
    %8 = vector.broadcast %cst_6 : f32 to vector<16x16xf32>
    %9 = arith.mulf %8, %5 : vector<16x16xf32>
    %10 = arith.select %7, %5, %9 : vector<16x16xi1>, vector<16x16xf32>
    %11 = arith.mulf %10, %10 : vector<16x16xf32>
    %cst_7 = arith.constant dense<0.000000e+00> : vector<16xf32>
    %12 = vector.multi_reduction <add>, %11, %cst_7 [1] : vector<16x16xf32> to vector<16xf32>
    %13 = vector.shape_cast %12 : vector<16xf32> to vector<16x1xf32>
    %14 = math.sqrt %13 : vector<16x1xf32>
    %cst_8 = arith.constant 9.99999971E-10 : f32
    %15 = vector.broadcast %cst_8 : f32 to vector<16x1xf32>
    %16 = arith.addf %14, %15 : vector<16x1xf32>
    %17 = tpu.reciprocal %16 {approx = true} : vector<16x1xf32> -> vector<16x1xf32>
    %18 = arith.mulf %16, %17 : vector<16x1xf32>
    %cst_9 = arith.constant 2.000000e+00 : f32
    %19 = vector.broadcast %cst_9 : f32 to vector<16x1xf32>
    %20 = arith.subf %19, %18 : vector<16x1xf32>
    %21 = arith.mulf %17, %20 : vector<16x1xf32>
    %22 = vector.broadcast %21 : vector<16x1xf32> to vector<16x16xf32>
    %23 = arith.mulf %10, %22 : vector<16x16xf32>
    %c0_10 = arith.constant 0 : index
    %c0_11 = arith.constant 0 : index
    %24 = vector.load %arg4[%c0_10, %c0_11] : memref<16x10xf32, #tpu.memory_space<vmem>>, vector<16x10xf32>
    %cst_12 = arith.constant dense<0.000000e+00> : vector<16x10xf32>
    %25 = tpu.matmul %23, %24, %cst_12 {dimension_numbers = #tpu.dot_dimension_numbers<[1], [0], [0], [1], [0, 0, 1, 1], [], []>} : vector<16x16xf32>, vector<16x10xf32>, vector<16x10xf32> -> vector<16x10xf32>
    %c0_13 = arith.constant 0 : index
    %c0_14 = arith.constant 0 : index
    %26 = vector.load %arg5[%c0_13, %c0_14] : memref<1x10xf32, #tpu.memory_space<vmem>>, vector<1x10xf32>
    %27 = vector.broadcast %26 : vector<1x10xf32> to vector<16x10xf32>
    %28 = arith.addf %25, %27 : vector<16x10xf32>
    %c0_15 = arith.constant 0 : index
    %c0_16 = arith.constant 0 : index
    %29 = vector.load %arg6[%c0_15, %c0_16] : memref<16x10xf32, #tpu.memory_space<vmem>>, vector<16x10xf32>
    tpu.vector_store %arg6[%c0_15, %c0_16], %28 {strides = array<i32>} : memref<16x10xf32, #tpu.memory_space<vmem>>, vector<16x10xf32>,
    %c0_17 = arith.constant 0 : index
    %c0_18 = arith.constant 0 : index
    %30 = vector.load %arg7[%c0_17, %c0_18] : memref<16x16xf32, #tpu.memory_space<vmem>>, vector<16x16xf32>
    tpu.vector_store %arg7[%c0_17, %c0_18], %23 {strides = array<i32>} : memref<16x16xf32, #tpu.memory_space<vmem>>, vector<16x16xf32>,
    return
  }
  func.func @transform_0(%arg0: i32) -> (i32, i32) {
    %c0_i32 = arith.constant 0 : i32
    %c0_i32_0 = arith.constant 0 : i32
    return %arg0, %c0_i32 : i32, i32
  }
  func.func @transform_1(%arg0: i32) -> (i32, i32) {
    %c0_i32 = arith.constant 0 : i32
    %c0_i32_0 = arith.constant 0 : i32
    %c0_i32_1 = arith.constant 0 : i32
    return %c0_i32, %c0_i32_0 : i32, i32
  }
  func.func @transform_2(%arg0: i32) -> (i32, i32) {
    %c0_i32 = arith.constant 0 : i32
    %c0_i32_0 = arith.constant 0 : i32
    %c0_i32_1 = arith.constant 0 : i32
    return %c0_i32, %c0_i32_0 : i32, i32
  }
  func.func @transform_3(%arg0: i32) -> (i32, i32) {
    %c0_i32 = arith.constant 0 : i32
    %c0_i32_0 = arith.constant 0 : i32
    %c0_i32_1 = arith.constant 0 : i32
    return %c0_i32, %c0_i32_0 : i32, i32
  }
  func.func @transform_4(%arg0: i32) -> (i32, i32) {
    %c0_i32 = arith.constant 0 : i32
    %c0_i32_0 = arith.constant 0 : i32
    %c0_i32_1 = arith.constant 0 : i32
    return %c0_i32, %c0_i32_0 : i32, i32
  }
  func.func @transform_5(%arg0: i32) -> (i32, i32) {
    %c0_i32 = arith.constant 0 : i32
    %c0_i32_0 = arith.constant 0 : i32
    return %arg0, %c0_i32 : i32, i32
  }
  func.func @transform_6(%arg0: i32) -> (i32, i32) {
    %c0_i32 = arith.constant 0 : i32
    %c0_i32_0 = arith.constant 0 : i32
    return %arg0, %c0_i32 : i32, i32
  }
}

</mosaic_0001>

<bundles_post_ra>
// kernel: hlq_branch.1
= control target key start
LH: loop header
LB: loop body
LE: loop exit
PB: predicated region body
PF: predicated region fallthrough
CT: control target
= control target key end

     0   :  { %s1394_s21 = smov 0   ;;  %s1396_s22 = smov 0   ;;  %s1554_s0 = inlined_call_operand.vmem [shape: f32[50,64], index: 0, kind: input, shape index: {}]   ;;  %s1555_s1 = inlined_call_operand.vmem [shape: f32[64,16], index: 1, kind: input, shape index: {}]   ;;  %s1556_s2 = inlined_call_operand.vmem [shape: f32[1,16], index: 2, kind: input, shape index: {}]   ;;  %s1557_s3 = inlined_call_operand.vmem [shape: f32[16,10], index: 3, kind: input, shape index: {}]   ;;  %s1558_s4 = inlined_call_operand.vmem [shape: f32[1,10], index: 4, kind: input, shape index: {}]   ;;  %s1559_s5 = inlined_call_operand.vmem [shape: f32[50,10], index: 5, kind: output, shape index: {0}]   ;;  %s1560_s6 = inlined_call_operand.vmem [shape: f32[50,16], index: 6, kind: output, shape index: {1}]  }
   0x1   :  { %s1398_s23 = smov 0  }
   0x2 LB: > { %s1407_s24 = sadd.s32 4294967295, %s1293_s23   ;;  %s1409_s25 = sadd.s32 1, %s1293_s23   ;;  %s1293_s23 = sphi %s1398_s23, %s1564_s23   ;;  %s1289_s22 = sphi %s1396_s22, %s1563_s22   ;;  %s1285_s21 = sphi %s1394_s21, %s1562_s21  }
   0x3   : > { %s131_s26 = ssub.s32 %s1293_s23, %s1409_s25  ;;  %s134_s27 = sadd.s32 1, %s1289_s22 }
   0x4   : > { %p132_p0 = scmp.eq.s32.totalorder %s131_s26, 0  ;;  %p144_p1 = scmp.ne.s32.totalorder %s1289_s22, %s1285_s21 }
   0x5   : > { %p145_p2 = scmp.eq.s32.totalorder %s1407_s24, 3  ;;  %p938_p3 = scmp.ge.s32.totalorder %s1293_s23, 1 }
   0x6   : > { %s1417_s28 = scalar_select %p132_p0, %s1289_s22, %s134_s27  }
   0x7   : > { %p1419_p4 = por %p145_p2, %p144_p1  ;;  %p224_p5 = scmp.lt.s32.totalorder %s1293_s23, 5 }
   0x9   : > { %p225_p6 = pnand %p938_p3, %p224_p5 }
   0xa   : > { %v287_v0 = vld [vmem:[%s1555_s1] sm:$0xff] (!%p225_p6)  ;;  %v288_v1 = vld [vmem:[%s1555_s1 + $0x8] sm:$0xff] (!%p225_p6)  ;;  %v289_v2 = vld [vmem:[%s1555_s1 + $0x10] sm:$0xff] (!%p225_p6)  ;;  %s1433_s12 = sshll.u32 (!%p225_p6), %s1407_s24, 1  ;;  %vm302_vm0 = vcmask (!%p225_p6), 523264   ;;  %vm392_vm3 = vcmask (!%p225_p6), 130048  }
   0xb   : > { %228 = sbr.rel (%p225_p6) target bundleno = 753 (0x2f1), region = 40  ;;  %v1027_v3 = vpack.c.bf16 (!%p225_p6), %v288_v1, %v287_v0  ;;  %v290_v4 = vld [vmem:[%s1555_s1 + $0x18] sm:$0xff] (!%p225_p6)  ;;  %p266_p7 = scmp.lt.s32.totalorder (!%p225_p6), %s1433_s12, 6  ;;  %v291_v6 = vld [vmem:[%s1555_s1 + $0x20] sm:$0xff] (!%p225_p6)  ;;  %v292_v7 = vld [vmem:[%s1555_s1 + $0x28] sm:$0xff] (!%p225_p6)  ;;  %vm515_vm8 = vcmask (!%p225_p6), 80896  }
   0xc   : > { %v1031_v5 = vpack.c.bf16 (!%p225_p6), %v290_v4, %v289_v2  ;;  %v1035_v8 = vpack.c.bf16 (!%p225_p6), %v292_v7, %v291_v6  ;;  %v293_v9 = vld [vmem:[%s1555_s1 + $0x30] sm:$0xff] (!%p225_p6)  ;;  %v294_v10 = vld [vmem:[%s1555_s1 + $0x38] sm:$0xff] (!%p225_p6)  ;;  %v943_v14 = vld [vmem:[%s1556_s2] ss:$0 sm:$0xff] (!%p225_p6)  ;;  %s252_s17 = sand.u32 (!%p225_p6), 1, %s1285_s21  }
   0xd   : > { %1028 = vmatprep.subr.bf16.mxu0 (!%p225_p6), %v1027_v3  ;;  %v1039_v12 = vpack.c.bf16 (!%p225_p6), %v294_v10, %v293_v9  ;;  %v425_v27 = vld [vmem:[%s1557_s3] sm:$0xff] (!%p225_p6)  ;;  %v426_v28 = vld [vmem:[%s1557_s3 + $0x8] sm:$0xff] (!%p225_p6)  ;;  %s939_s18 = sshll.u32 (!%p225_p6), %s252_s17, 4 }
   0xe   : > { %1030 = vmatpush3.bf16.msra.mxu0 (!%p225_p6), %v1027_v3  ;;  %v1043_v29 = vpack.c.bf16 (!%p225_p6), %v426_v28, %v425_v27  ;;  %v946_v54 = vld [vmem:[%s1558_s4] ss:$0 sm:$0xff] (!%p225_p6)  ;;  %s1478_s23 = scalar_lea.vmem (!%p225_p6), [#allocation2], %s939_s18  }
   0xf   : > { %1032 = vmatprep.subr.bf16.mxu0 (!%p225_p6), %v1031_v5 }
  0x10   : > { %1044 = vmatprep.subr.bf16.mxu1 (!%p225_p6), %v1043_v29 }
  0x11   : > { %1046 = vmatpush3.bf16.msra.mxu1 (!%p225_p6), %v1043_v29 }
  0x12   : > { %s267_s19 = scalar_select %p266_p7, %s1433_s12, 6  ;;  %1034 = vmatpush3.bf16.msra.mxu0 %v1031_v5 }
  0x13   : > { %1036 = vmatprep.subr.bf16.mxu0 %v1035_v8  ;;  %s532_s26 = ssub.s32 (%p1419_p4), 7, %s1433_s12  ;;  %s981_s27 = sshll.u32 (%p1419_p4), %s1407_s24, 4 }
  0x14   : > { %s942_s20 = sshll.u32 %s267_s19, 3  ;;  %s1468_s19 = scalar_lea.vmem [#allocation3], %s939_s18  }
  0x15   : > { %s269_s9 = scalar_lea.vmem %s1554_s0, %s942_s20  ;;  %p533_p8 = scmp.lt.s32.totalorder (%p1419_p4), %s532_s26, 2 }
  0x16   : > { %v285_v11 = vld [vmem:[%s269_s9] sm:$0xff]  ;;  %1038 = vmatpush3.bf16.msra.mxu0 %v1035_v8  ;;  %v286_v13 = vld [vmem:[%s269_s9 + $0x8] sm:$0xff]  ;;  %s1489_s8 = scalar_lea.vmem (%p1419_p4), %s1559_s5, %s981_s27  }
  0x17   : > { %1017 = vmatprep.mubr.msk.f32.mxu0 %vm302_vm0, %v285_v11  ;;  %1040 = vmatprep.subr.bf16.mxu0 %v1039_v12 }
  0x1a   : > { %1042 = vmatpush3.bf16.msra.mxu0 %v1039_v12 }
  0x1d   : > { %1018 = vmatmul.mubr.msk.f32.vlgmr.msra.gmra.mrb[0].mxu0 %vm302_vm0, %v286_v13 }
  0xf0   : > { %v1019_v15 = vpop.f32.mrb[0].mxu0 }
  0xf1   : > { %v381_v16 = vadd.f32 %v1019_v15, %v943_v14  ;;  %v375_v17 = vpop.f32.mrb[1].mxu0 }
  0xf2   : > { %v376_v18 = vadd.f32 %v943_v14, %v375_v17 }
  0xf3   : > { %vm385_vm1 = vcmp.ge.f32.partialorder %v381_v16, 0.0  ;;  %v387_v19 = vmul.f32 0.01, %v381_v16 }
  0xf4   : > { %v386_v20 = vmul.f32 0.01, %v376_v18  ;;  %vm384_vm2 = vcmp.ge.f32.partialorder %v376_v18, 0.0 }
  0xf5   : > { %v389_v22 = vsel %vm385_vm1, %v381_v16, %v387_v19 }
  0xf6   : > { %v388_v21 = vsel %vm384_vm2, %v376_v18, %v386_v20  ;;  %v391_v25 = vmul.f32 %v389_v22, %v389_v22 }
  0xf7   : > { %v390_v23 = vmul.f32 %v388_v21, %v388_v21 }
  0xf8   : > { %v396_v26 = vsel %vm392_vm3, %v391_v25, 0.0 }
  0xf9   : > { %v393_v24 = vsel %vm392_vm3, %v390_v23, 0.0 }
  0xfa   : > { %394 = vadd.xlane.f32.xlu0 %v393_v24 }
  0xfe   : > { %397 = vadd.xlane.f32.xlu0 %v396_v26 }
 0x187   : > { %v395_v30 = vpop.xlane.xlu0 %394 }
 0x188   : > { %1199 = vrsqrt.f32 %v395_v30  ;;  %vm401_vm4 = vcmp.eq.f32.partialorder %v395_v30, inf  ;;  %v404_v34 = vand.u32 2147483648, %v395_v30  ;;  %vm403_vm5 = vcmp.eq.f32.partialorder %v395_v30, 0.0 }
 0x18b   : > { %v398_v31 = vpop.xlane.xlu0 %397 }
 0x18c   : > { %1201 = vrsqrt.f32 %v398_v31  ;;  %vm408_vm6 = vcmp.eq.f32.partialorder %v398_v31, inf  ;;  %v411_v40 = vand.u32 2147483648, %v398_v31  ;;  %vm410_vm7 = vcmp.eq.f32.partialorder %v398_v31, 0.0 }
 0x192   : > { %v1200_v32 = vpop.eup %1199 }
 0x193   : > { %v400_v33 = vmul.f32 %v1200_v32, %v395_v30 }
 0x195   : > { %v402_v35 = vsel %vm401_vm4, %v395_v30, %v400_v33 }
 0x196   : > { %v1202_v36 = vpop.eup %1201  ;;  %v405_v37 = vsel %vm403_vm5, %v404_v34, %v402_v35 }
 0x197   : > { %v407_v38 = vmul.f32 %v1202_v36, %v398_v31  ;;  %v413_v39 = vadd.f32 1e-09, %v405_v37 }
 0x199   : > { %v409_v41 = vsel %vm408_vm6, %v398_v31, %v407_v38  ;;  %1203 = vrcp.f32 %v413_v39 }
 0x19a   : > { %v412_v42 = vsel %vm410_vm7, %v411_v40, %v409_v41 }
 0x19b   : > { %v414_v43 = vadd.f32 1e-09, %v412_v42 }
 0x19d   : > { %1205 = vrcp.f32 %v414_v43 }
 0x1a3   : > { %v1204_v44 = vpop.eup %1203 }
 0x1a4   : > { %v417_v45 = vmul.f32 %v1204_v44, %v413_v39 }
 0x1a6   : > { %v419_v46 = vsub.f32 2.0, %v417_v45 }
 0x1a7   : > { %v1206_v47 = vpop.eup %1205 }
 0x1a8   : > { %v421_v48 = vmul.f32 %v1204_v44, %v419_v46  ;;  %v418_v49 = vmul.f32 %v1206_v47, %v414_v43 }
 0x1aa   : > { %v423_v50 = vmul.f32 %v421_v48, %v388_v21  ;;  %v420_v51 = vsub.f32 2.0, %v418_v49 }
 0x1ac   : > { %1024 = vmatprep.mubr.msk.f32.mxu1 %vm392_vm3, %v423_v50  ;;  %518 = vst.msk [vmem:[%s1468_s19] sm:$0xff] %vm392_vm3, %v423_v50  ;;  %v422_v52 = vmul.f32 %v1206_v47, %v420_v51 }
 0x1ae   : > { %v424_v53 = vmul.f32 %v422_v52, %v389_v22 }
 0x1b0   : > { %1025 = vmatmul.mubr.msk.f32.vlgmr.msra.gmra.mrb[0].mxu1 %vm392_vm3, %v424_v53  ;;  %519 = vst.msk [vmem:[%s1468_s19 + $0x8] sm:$0xff] %vm392_vm3, %v424_v53 }
 0x281   : > { %530 = sbr.rel (!%p1419_p4) target bundleno = 697 (0x2b9), region = 44 }
 0x283   : > { %v1026_v55 = vpop.f32.mrb[0].mxu1 }
 0x284   : > { %v512_v56 = vadd.f32 %v1026_v55, %v946_v54  ;;  %v506_v57 = vpop.f32.mrb[1].mxu1 }
 0x285   : > { %v507_v58 = vadd.f32 %v946_v54, %v506_v57 }
 0x286   : > { %517 = vst.msk [vmem:[%s1478_s23 + $0x8] sm:$0xff] %vm515_vm8, %v512_v56 }
 0x287   : > { %516 = vst.msk [vmem:[%s1478_s23] sm:$0xff] %vm515_vm8, %v507_v58 }
 0x288   : > { %s1566_s26 = smov (!%p533_p8, %s532_s26), 2 }
 0x289   : > { %s952_s9 = sshll.u32 %s1566_s26, 7 }
 0x28a   : > { %p955_p9 = scmp.eq.s32.totalorder %s952_s9, 0 }
 0x28b   : > { %s1495_s10 = sshrl.u32 (!%p955_p9), %s1566_s26, 1 }
 0x28c   : > { %541 = sbr.rel (%p955_p9) target bundleno = 697 (0x2b9), region = 48  ;;  %p956_p10 = scmp.le.s32.totalorder (!%p955_p9), %s1495_s10, 0 }
 0x293   : > { %854 = sbr.rel (%p956_p10) target bundleno = 676 (0x2a4), region = 196  ;;  %s1295_s11 = smov (!%p956_p10), %s1489_s8  }
 0x294   : > { %s1299_s13 = smov (!%p956_p10), %s1478_s23   ;;  %s1303_s14 = smov (!%p956_p10), 0  }
 0x295   : > { %s1307_s15 = smov (!%p956_p10), 0  }
 0x29a LB: >> { %v605_v59 = vld [vmem:[%s1301_s13] sm:$0xff]  ;;  %v607_v60 = vld [vmem:[%s1301_s13 + $0x8] sm:$0xff]  ;;  %s609_s16 = sadd.s32 1, %s1305_s14  ;;  %s599_s15 = sadd.s32 1, %s1309_s15   ;;  %s1309_s15 = sphi %s1307_s15, %s599_s15   ;;  %s1305_s14 = sphi %s1303_s14, %s1304_s14   ;;  %s1301_s13 = sphi %s1299_s13, %s614_s13   ;;  %s1297_s11 = sphi %s1295_s11, %s615_s11  }
 0x29b   : >> { %606 = vst [vmem:[%s1297_s11] sm:$0xff] %v605_v59  ;;  %608 = vst [vmem:[%s1297_s11 + $0x8] sm:$0xff] %v607_v60  ;;  %p610_p11 = scmp.ge.s32.totalorder %s609_s16, %s1495_s10  ;;  %p598_p12 = scmp.ge.s32.totalorder %s599_s15, %s1495_s10 }
 0x29d   : >> { %s1568_s16 = smov (%p610_p11, %s609_s16), 0  ;;  %601 = sbr.rel (!%p598_p12) target bundleno = 666 (0x29a), region = 202 }
 0x29e   : >> { %s957_s17 = sshll.u32 %s1568_s16, 4  ;;  %s1304_s14 = smov %s1568_s16  }
 0x29f   : >> { %s614_s13 = scalar_lea.vmem %s1478_s23, %s957_s17 [#allocation2]   ;;  %s615_s11 = scalar_lea.vmem %s1489_s8, %s957_s17  }
 0x2a4 PF: > { %s1505_s18 = sand.u32 1, %s1566_s26   ;;  %s982_s21 = sshll.u32 %s1495_s10, 4 }
 0x2a5   : > { %s620_s20 = scalar_lea.vmem %s1478_s23, %s982_s21 [#allocation2]   ;;  %s622_s27 = scalar_lea.vmem %s1489_s8, %s982_s21  }
 0x2a6   : > { %p962_p13 = scmp.le.s32.totalorder %s1505_s18, 0 }
 0x2a7   : > { %s1311_s30 = smov (!%p962_p13), %s622_s27   ;;  %s1315_s7 = smov (!%p962_p13), %s620_s20  }
 0x2a8   : > { %868 = sbr.rel (%p962_p13) target bundleno = 697 (0x2b9), region = 207  ;;  %s1319_s9 = smov (!%p962_p13), 0  }
 0x2a9   : > { %s1323_s11 = smov (!%p962_p13), 0  }
 0x2af LB: >> { %v632_v61 = vld [vmem:[%s1317_s7] sm:$0xff]  ;;  %s634_s26 = sadd.s32 1, %s1321_s9  ;;  %s626_s11 = sadd.s32 1, %s1325_s11   ;;  %s1325_s11 = sphi %s1323_s11, %s626_s11   ;;  %s1321_s9 = sphi %s1319_s9, %s1320_s9   ;;  %s1317_s7 = sphi %s1315_s7, %s639_s7   ;;  %s1313_s30 = sphi %s1311_s30, %s640_s30  }
 0x2b0   : >> { %633 = vst [vmem:[%s1313_s30] sm:$0xff] %v632_v61  ;;  %p635_p0 = scmp.ge.s32.totalorder %s634_s26, %s1505_s18  ;;  %p625_p1 = scmp.ge.s32.totalorder %s626_s11, %s1505_s18 }
 0x2b2   : >> { %s1570_s26 = smov (%p635_p0, %s634_s26), 0  ;;  %628 = sbr.rel (!%p625_p1) target bundleno = 687 (0x2af), region = 213 }
 0x2b3   : >> { %s963_s23 = sshll.u32 %s1570_s26, 3  ;;  %s1320_s9 = smov %s1570_s26  }
 0x2b4   : >> { %s639_s7 = scalar_lea.vmem %s620_s20, %s963_s23 [#allocation2]   ;;  %s640_s30 = scalar_lea.vmem %s622_s27, %s963_s23  }
 0x2b9 PF: > { %646 = sbr.rel (!%p1419_p4) target bundleno = 753 (0x2f1), region = 96  ;;  %s648_s8 = ssub.s32 (%p1419_p4), 7, %s1433_s12 }
 0x2ba   : > { %s984_s10 = sshll.u32 (%p1419_p4), %s1407_s24, 4  ;;  %p649_p2 = scmp.lt.s32.totalorder (%p1419_p4), %s648_s8, 2 }
 0x2bb   : > { %s1520_s15 = scalar_lea.vmem (%p1419_p4), %s1560_s6, %s984_s10  }
 0x2c0   : > { %s1572_s8 = smov (!%p649_p2, %s648_s8), 2 }
 0x2c1   : > { %s966_s16 = sshll.u32 %s1572_s8, 7 }
 0x2c2   : > { %p969_p3 = scmp.eq.s32.totalorder %s966_s16, 0 }
 0x2c3   : > { %s1526_s17 = sshrl.u32 (!%p969_p3), %s1572_s8, 1 }
 0x2c4   : > { %657 = sbr.rel (%p969_p3) target bundleno = 753 (0x2f1), region = 100  ;;  %p970_p4 = scmp.le.s32.totalorder (!%p969_p3), %s1526_s17, 0 }
 0x2cb   : > { %882 = sbr.rel (%p970_p4) target bundleno = 732 (0x2dc), region = 218  ;;  %s1327_s24 = smov (!%p970_p4), %s1520_s15  }
 0x2cc   : > { %s1331_s29 = smov (!%p970_p4), %s1468_s19   ;;  %s1335_s12 = smov (!%p970_p4), 0  }
 0x2cd   : > { %s1339_s18 = smov (!%p970_p4), 0  }
 0x2d2 LB: >> { %v721_v62 = vld [vmem:[%s1333_s29] sm:$0xff]  ;;  %v723_v63 = vld [vmem:[%s1333_s29 + $0x8] sm:$0xff]  ;;  %s725_s21 = sadd.s32 1, %s1337_s12  ;;  %s715_s18 = sadd.s32 1, %s1341_s18   ;;  %s1341_s18 = sphi %s1339_s18, %s715_s18   ;;  %s1337_s12 = sphi %s1335_s12, %s1336_s12   ;;  %s1333_s29 = sphi %s1331_s29, %s730_s29   ;;  %s1329_s24 = sphi %s1327_s24, %s731_s24  }
 0x2d3   : >> { %722 = vst [vmem:[%s1329_s24] sm:$0xff] %v721_v62  ;;  %724 = vst [vmem:[%s1329_s24 + $0x8] sm:$0xff] %v723_v63  ;;  %p726_p5 = scmp.ge.s32.totalorder %s725_s21, %s1526_s17  ;;  %p714_p6 = scmp.ge.s32.totalorder %s715_s18, %s1526_s17 }
 0x2d5   : >> { %s1574_s21 = smov (%p726_p5, %s725_s21), 0  ;;  %717 = sbr.rel (!%p714_p6) target bundleno = 722 (0x2d2), region = 224 }
 0x2d6   : >> { %s971_s20 = sshll.u32 %s1574_s21, 4  ;;  %s1336_s12 = smov %s1574_s21  }
 0x2d7   : >> { %s730_s29 = scalar_lea.vmem %s1468_s19, %s971_s20 [#allocation3]   ;;  %s731_s24 = scalar_lea.vmem %s1520_s15, %s971_s20  }
 0x2dc PF: > { %s1536_s27 = sand.u32 1, %s1572_s8   ;;  %s985_s30 = sshll.u32 %s1526_s17, 4 }
 0x2dd   : > { %s736_s7 = scalar_lea.vmem %s1468_s19, %s985_s30 [#allocation3]   ;;  %s738_s9 = scalar_lea.vmem %s1520_s15, %s985_s30  }
 0x2de   : > { %p976_p7 = scmp.le.s32.totalorder %s1536_s27, 0 }
 0x2df   : > { %s1343_s11 = smov (!%p976_p7), %s738_s9   ;;  %s1347_s26 = smov (!%p976_p7), %s736_s7  }
 0x2e0   : > { %896 = sbr.rel (%p976_p7) target bundleno = 753 (0x2f1), region = 229  ;;  %s1351_s23 = smov (!%p976_p7), 0  }
 0x2e1   : > { %s1355_s10 = smov (!%p976_p7), 0  }
 0x2e7 LB: >> { %v748_v0 = vld [vmem:[%s1349_s26] sm:$0xff]  ;;  %s750_s8 = sadd.s32 1, %s1353_s23  ;;  %s742_s10 = sadd.s32 1, %s1357_s10   ;;  %s1357_s10 = sphi %s1355_s10, %s742_s10   ;;  %s1353_s23 = sphi %s1351_s23, %s1352_s23   ;;  %s1349_s26 = sphi %s1347_s26, %s755_s26   ;;  %s1345_s11 = sphi %s1343_s11, %s756_s11  }
 0x2e8   : >> { %749 = vst [vmem:[%s1345_s11] sm:$0xff] %v748_v0  ;;  %p751_p8 = scmp.ge.s32.totalorder %s750_s8, %s1536_s27  ;;  %p741_p9 = scmp.ge.s32.totalorder %s742_s10, %s1536_s27 }
 0x2ea   : >> { %s1576_s8 = smov (%p751_p8, %s750_s8), 0  ;;  %744 = sbr.rel (!%p741_p9) target bundleno = 743 (0x2e7), region = 235 }
 0x2eb   : >> { %s977_s19 = sshll.u32 %s1576_s8, 3  ;;  %s1352_s23 = smov %s1576_s8  }
 0x2ec   : >> { %s755_s26 = scalar_lea.vmem %s736_s7, %s977_s19 [#allocation3]   ;;  %s756_s11 = scalar_lea.vmem %s738_s9, %s977_s19  }
 0x2f1 PF: > { %p14_p10 = scmp.ge.s32.totalorder %s1409_s25, 6   ;;  %s1562_s21 = smov %s1289_s22 }
 0x2f2   : > { %s1563_s22 = smov %s1417_s28  ;;  %s1564_s23 = smov %s1409_s25 }
 0x2f3   :  { %16 = sbr.rel (!%p14_p10) target bundleno = 2 (0x2), region = 246 }

</bundles_post_ra>
